<compile_context>
chip_gen: v5e
topology: v5e:2x2
jax: 0.10.0
libtpu: 0.0.40
codegen_flags: <defaults>
</compile_context>

<pallas_src>
import numpy as np
import jax
import jax.numpy as jnp
from jax.experimental import pallas as pl
from jax.experimental.pallas import tpu as pltpu

# Semantic shape constants (as in SPINE)
SHOWR_SHP, TRACK_SHP, MICHL_SHP, DELTA_SHP = 0, 1, 2, 3
BATCH_COL = 0
COORD_COLS = (1, 2, 3)

_BIG = np.int32(2 ** 30)          # sentinel label (select form, no adds)
_PAD_SENTINEL = 1.0e6             # far-away coordinate for padded rows
_MAX_BLOCK_PAD = 1024             # single-block ceiling (fits 32 MiB VMEM budget)
_VMEM_LIMIT = 32 * 1024 * 1024


def _dbscan_cc_kernel(coords_ref, out_ref, adj_ref, done_ref):
    """Connected components of the unit-radius graph for one padded block.

    coords_ref : (1, nb, 8) f32  -- centred coords / eps in lanes 0..2, padded
                                    rows placed at a far sentinel position
    out_ref    : (1, 1, nb) i32  -- block-local component root index per voxel
    adj_ref    : (nb, nb) bf16 VMEM scratch -- adjacency / reachability matrix
    done_ref   : (1,) i32 SMEM scratch      -- convergence flag
    """
    coords = coords_ref[0]                                        # (nb, 8)
    nb = coords.shape[0]

    # Exact f32 squared pairwise distances via direct differences (3 coords).
    # Coords are pre-scaled by 1/eps on the host so the test is d2 <= 1.0.
    d2 = jnp.zeros((nb, nb), jnp.float32)
    for k in range(3):
        c = coords[:, k:k + 1]                                    # (nb, 1)
        diff = c - jnp.transpose(c)                               # (nb, nb)
        d2 = d2 + diff * diff

    # Adjacency with self-loops (d2[i,i] = 0 <= 1).  0/1 values are exact in
    # bf16, which is what the MXU wants for the squaring below.
    adj_ref[...] = (d2 <= 1.0).astype(jnp.bfloat16)
    done_ref[0] = jnp.int32(0)

    # Boolean-matrix squaring: after k squarings the reach covers 2^k hops, so
    # ceil(log2(nb)) iterations guarantee full transitive closure.  The SMEM
    # "done" flag early-exits the (MXU-heavy) body once the reach converges.
    max_iters = max(1, int(np.ceil(np.log2(nb))))

    @pl.loop(0, max_iters)
    def _(it):
        @pl.when(done_ref[0] == 0)
        def _():
            a = adj_ref[...]                                      # (nb, nb) bf16
            a2 = jnp.dot(a, a, preferred_element_type=jnp.float32)
            a_new = (a2 > 0.0).astype(jnp.bfloat16)
            adj_ref[...] = a_new
            # Reach only grows (self-loops), so "unchanged" == converged.
            done_ref[0] = jnp.min((a_new == a).astype(jnp.int32))

    # Component label = smallest reachable index (symmetric reach, reduce over
    # the sublane axis to produce a lane-dense (1, nb) output directly).
    reach = adj_ref[...]
    row_idx = jax.lax.broadcasted_iota(jnp.int32, (nb, nb), 0)
    out_ref[0] = jnp.min(jnp.where(reach > 0.0, row_idx, _BIG),
                         axis=0, keepdims=True)


@jax.jit
def _run_cc(coords_blocks):
    """coords_blocks: (n_blocks, nb_pad, 8) f32 -> (n_blocks, 1, nb_pad) i32."""
    n_blocks, nb, _ = coords_blocks.shape
    return pl.pallas_call(
        _dbscan_cc_kernel,
        out_shape=jax.ShapeDtypeStruct((n_blocks, 1, nb), jnp.int32),
        grid=(n_blocks,),
        in_specs=[pl.BlockSpec((1, nb, 8), lambda b: (b, 0, 0))],
        out_specs=pl.BlockSpec((1, 1, nb), lambda b: (b, 0, 0)),
        scratch_shapes=[pltpu.VMEM((nb, nb), jnp.bfloat16),
                        pltpu.SMEM((1,), jnp.int32)],
        compiler_params=pltpu.CompilerParams(
            dimension_semantics=("parallel",),      # blocks shard across TCs
            vmem_limit_bytes=_VMEM_LIMIT),
    )(coords_blocks)


class DBSCAN:
    """JAX/Pallas re-implementation of the SPINE DBSCAN fragmenter."""

    def __init__(self, eps=1.8, min_samples=1, min_size=3, metric='euclidean',
                 shapes=(SHOWR_SHP, TRACK_SHP, MICHL_SHP, DELTA_SHP),
                 break_shapes=(), break_mask_radius=5.0,
                 break_track_method='masked_dbscan',
                 use_label_break_points=False, track_include_delta=False,
                 ppn_predictor=None):
        assert not np.isscalar(shapes), \
            'Semantic classes should be provided as a list.'
        self.shapes = list(shapes)
        nshapes = len(self.shapes)

        def _bcast(v, name):
            if np.isscalar(v):
                return nshapes * [v]
            assert len(v) == nshapes, \
                f'The number of `{name}` values does not match the shapes.'
            return list(v)

        self.eps = _bcast(eps, 'eps')
        self.min_samples = _bcast(min_samples, 'min_samples')
        self.min_size = _bcast(min_size, 'min_size')
        self.metric = _bcast(metric, 'metric')
        self.break_mask_radius = _bcast(break_mask_radius, 'break_mask_radius')

        # TODO(synk): PPN / label-point based instance breaking
        # (PointBreakClusterer, 'masked_dbscan' / 'closest_path') has no clean
        # Pallas equivalent here; pure DBSCAN is run on every requested shape.
        self.break_shapes = list(break_shapes)
        self.break_track_method = break_track_method
        self.use_label_break_points = use_label_break_points
        self.track_include_delta = track_include_delta

        assert all(m == 1 for m in self.min_samples), \
            'This Pallas kernel implements min_samples=1 (the module default).'
        assert all(m == 'euclidean' for m in self.metric), \
            'This Pallas kernel implements the euclidean metric only.'

    # ----------------------------------------------------------------- blocks
    def _gather_blocks(self, data_np, seg_np, edges):
        """Splits voxels into (batch, class) blocks and preconditions coords."""
        blocks = []            # (batch, class idx k, class s, shape_index, pts)
        batch_size = len(edges) - 1
        for b in range(batch_size):
            lo, hi = int(edges[b]), int(edges[b + 1])
            seg_b = seg_np[lo:hi]
            vox_b = data_np[lo:hi][:, COORD_COLS[0]:COORD_COLS[-1] + 1]
            vox_b = vox_b.astype(np.float64)
            for k, s in enumerate(self.shapes):
                shape_index = np.where(seg_b == s)[0]
                if not len(shape_index):
                    continue
                pts = vox_b[shape_index]
                # Centre (keeps f32 magnitudes small) and pre-divide by eps so
                # the kernel compares against 1.0.
                pts = (pts - pts.mean(axis=0)) / float(self.eps[k])
                blocks.append((b, k, s, shape_index, pts.astype(np.float32)))
        return blocks

    # ----------------------------------------------------------------- kernel
    def compute_block_labels(self, blocks):
        """Runs the Pallas kernel over all blocks (bucketed by padded size)."""
        if not blocks:
            return []
        results = [None] * len(blocks)
        # Bucket blocks by their own padded size so small blocks do not pay
        # the largest block's nb^3 squaring cost.
        buckets = {}
        for bi, (_, _, _, shape_index, _) in enumerate(blocks):
            m = len(shape_index)
            nb_pad = max(128, int(np.ceil(m / 128.0)) * 128)
            # TODO(synk): row-tile the adjacency with a persistent label
            # scratch for blocks larger than _MAX_BLOCK_PAD voxels.
            assert nb_pad <= _MAX_BLOCK_PAD, (
                f'Single (batch, class) block of {m} voxels exceeds the '
                f'{_MAX_BLOCK_PAD}-voxel single-block ceiling.')
            buckets.setdefault(nb_pad, []).append(bi)

        for nb_pad, idxs in sorted(buckets.items()):
            coords_blocks = np.zeros((len(idxs), nb_pad, 8), np.float32)
            for j, bi in enumerate(idxs):
                pts = blocks[bi][4]
                m = len(pts)
                coords_blocks[j, :m, :3] = pts
                coords_blocks[j, m:, 0] = _PAD_SENTINEL  # padding never connects
            labels_dev = _run_cc(jnp.asarray(coords_blocks))
            labels_np = np.asarray(jax.block_until_ready(labels_dev))[:, 0, :]
            for j, bi in enumerate(idxs):
                results[bi] = labels_np[j, :len(blocks[bi][3])]
        return results

    # ---------------------------------------------------------------- forward
    def forward(self, data, seg_pred, coord_label=None, **ppn_result):
        """Mirrors DBSCAN.forward: returns (index, shapes).

        data     : (N, 1 + D + 1) array -- [batch, x, y, z, value], batch-sorted
        seg_pred : (N,) segmentation class per voxel
        """
        data_np = np.asarray(data, np.float64)
        seg_np = np.asarray(seg_pred)
        n = data_np.shape[0]
        batch_np = data_np[:, BATCH_COL].astype(np.int64)

        batch_size = int(batch_np.max()) + 1 if n else 0
        per_batch = np.array([(batch_np == b).sum() for b in range(batch_size)],
                             dtype=np.int64)
        edges = np.concatenate([[0], np.cumsum(per_batch)]).astype(np.int64)
        offsets = edges[:-1]

        blocks = self._gather_blocks(data_np, seg_np, edges)
        block_labels = self.compute_block_labels(blocks)

        clusts, shapes_out, counts, single_counts = [], [], [], []
        bi = 0
        for b in range(batch_size):
            clusts_b, counts_b, shapes_b = [], [], []
            while bi < len(blocks) and blocks[bi][0] == b:
                _, k, s, shape_index, _ = blocks[bi]
                roots = block_labels[bi]          # cluster root per masked voxel
                clusts_b_s = []
                for c in np.unique(roots):
                    clust = np.where(roots == c)[0]
                    if c > -1 and len(clust) > self.min_size[k]:
                        clusts_b_s.append(int(offsets[b]) + clust)
                        counts_b.append(len(clust))
                clusts_b.extend(clusts_b_s)
                shapes_b.append(s * np.ones(len(clusts_b_s), dtype=np.int64))
                bi += 1
            clusts.extend(clusts_b)
            shapes_out.extend(shapes_b)
            counts.append(len(clusts_b))
            single_counts.extend(counts_b)

        # TODO(synk): IndexBatch/TensorBatch containers are not available here;
        # return the same payload as plain python/numpy structures.
        index = {'clusts': clusts, 'offsets': offsets,
                 'counts': counts, 'single_counts': single_counts}
        shapes_out = (np.concatenate(shapes_out) if len(shapes_out)
                      else np.empty(0, dtype=np.int64))
        return index, shapes_out

    __call__ = forward


# --------------------------------------------------------------------- tests
def _np_components(pts, eps):
    """Reference connected components of the eps-graph (f64, BFS)."""
    n = len(pts)
    d2 = ((pts[:, None, :] - pts[None, :, :]) ** 2).sum(-1)
    adj = d2 <= eps * eps
    labels = -np.ones(n, dtype=np.int64)
    cur = 0
    for i in range(n):
        if labels[i] >= 0:
            continue
        stack = [i]
        labels[i] = cur
        while stack:
            u = stack.pop()
            for v in np.where(adj[u])[0]:
                if labels[v] < 0:
                    labels[v] = cur
                    stack.append(v)
        cur += 1
    return labels


def _canon(labels):
    """Relabels by first occurrence so partitions can be compared directly."""
    seen, nxt = {}, 0
    out = np.empty(len(labels), np.int64)
    for i, lab in enumerate(labels):
        lab = int(lab)
        if lab not in seen:
            seen[lab] = nxt
            nxt += 1
        out[i] = seen[lab]
    return out


if __name__ == "__main__":
    key = jax.random.PRNGKey(0)
    k1, k2, k3 = jax.random.split(key, 3)

    # Two-event batch, 40 voxels each.  Integer (voxel-like) coordinates in a
    # 12^3 box keep pairwise distances far from the eps = 1.8 boundary, so the
    # f32 kernel and the f64 numpy reference agree exactly on the partition.
    n0, n1 = 40, 40
    n = n0 + n1
    coords = jnp.round(jax.random.uniform(k1, (n, 3), jnp.float32, 0.0, 12.0))
    values = jax.random.uniform(k2, (n, 1), jnp.float32)
    batch_col = jnp.concatenate([jnp.zeros((n0, 1), jnp.float32),
                                 jnp.ones((n1, 1), jnp.float32)], axis=0)
    data = jnp.concatenate([batch_col, coords, values], axis=1)   # (N, 1+3+1)
    seg_pred = jax.random.randint(k3, (n,), 0, 4, jnp.int32)

    # Direct kernel check on one padded block against the numpy reference.
    eps = 1.8
    pts = np.asarray(coords, np.float64)[:n0]
    test_block = np.zeros((1, 128, 8), np.float32)
    test_block[0, :n0, :3] = ((pts - pts.mean(axis=0)) / eps).astype(np.float32)
    test_block[0, n0:, 0] = _PAD_SENTINEL
    labels_dev = _run_cc(jnp.asarray(test_block))
    kernel_labels = np.asarray(jax.block_until_ready(labels_dev))[0, 0, :n0]
    ref_labels = _np_components(pts, eps)
    assert np.array_equal(_canon(kernel_labels), _canon(ref_labels)), \
        'Pallas connected components disagree with the numpy reference.'

    # Full forward (per-(batch, class) block kernel + numpy glue packaging).
    model = DBSCAN()
    index, shapes = model(data, seg_pred)

    print("KERNEL_OK")
</pallas_src>

<mosaic_0001>
module attributes {stable_mosaic.version = 11 : i64} {
  func.func @_dbscan_cc_kernel(%arg0: i32, %arg1: memref<1x128x8xf32, #tpu.memory_space<vmem>>, %arg2: memref<1x1x128xi32, #tpu.memory_space<vmem>>, %arg3: memref<128x128xbf16, #tpu.memory_space<vmem>>, %arg4: memref<1xi32, #tpu.memory_space<smem>>) attributes {dimension_semantics = [#tpu.dimension_semantics<parallel>], iteration_bounds = array<i64: 1>, scalar_prefetch = 0 : i64, scratch_operands = 2 : i64, tpu.core_type = #tpu.core_type<tc>, window_params = [{transform_indices = @transform_0, window_bounds = array<i64: 1, 128, 8>}, {transform_indices = @transform_1, window_bounds = array<i64: 1, 1, 128>}]} {
    %c0 = arith.constant 0 : index
    %c0_0 = arith.constant 0 : index
    %c0_1 = arith.constant 0 : index
    %0 = vector.load %arg1[%c0, %c0_0, %c0_1] : memref<1x128x8xf32, #tpu.memory_space<vmem>>, vector<1x128x8xf32>
    %1 = vector.shape_cast %0 : vector<1x128x8xf32> to vector<128x8xf32>
    %cst = arith.constant 0.000000e+00 : f32
    %2 = vector.broadcast %cst : f32 to vector<128x128xf32>
    %3 = vector.extract_strided_slice %1 {offsets = [0, 0], sizes = [128, 1], strides = [1, 1]} : vector<128x8xf32> to vector<128x1xf32>
    %4 = tpu.transpose %3, [1, 0] : vector<128x1xf32> -> vector<1x128xf32>
    %5 = vector.broadcast %3 : vector<128x1xf32> to vector<128x128xf32>
    %6 = vector.broadcast %4 : vector<1x128xf32> to vector<128x128xf32>
    %7 = arith.subf %5, %6 : vector<128x128xf32>
    %8 = arith.mulf %7, %7 : vector<128x128xf32>
    %9 = arith.addf %2, %8 : vector<128x128xf32>
    %10 = vector.extract_strided_slice %1 {offsets = [0, 1], sizes = [128, 1], strides = [1, 1]} : vector<128x8xf32> to vector<128x1xf32>
    %11 = tpu.transpose %10, [1, 0] : vector<128x1xf32> -> vector<1x128xf32>
    %12 = vector.broadcast %10 : vector<128x1xf32> to vector<128x128xf32>
    %13 = vector.broadcast %11 : vector<1x128xf32> to vector<128x128xf32>
    %14 = arith.subf %12, %13 : vector<128x128xf32>
    %15 = arith.mulf %14, %14 : vector<128x128xf32>
    %16 = arith.addf %9, %15 : vector<128x128xf32>
    %17 = vector.extract_strided_slice %1 {offsets = [0, 2], sizes = [128, 1], strides = [1, 1]} : vector<128x8xf32> to vector<128x1xf32>
    %18 = tpu.transpose %17, [1, 0] : vector<128x1xf32> -> vector<1x128xf32>
    %19 = vector.broadcast %17 : vector<128x1xf32> to vector<128x128xf32>
    %20 = vector.broadcast %18 : vector<1x128xf32> to vector<128x128xf32>
    %21 = arith.subf %19, %20 : vector<128x128xf32>
    %22 = arith.mulf %21, %21 : vector<128x128xf32>
    %23 = arith.addf %16, %22 : vector<128x128xf32>
    %cst_2 = arith.constant 1.000000e+00 : f32
    %24 = vector.broadcast %cst_2 : f32 to vector<128x128xf32>
    %25 = arith.cmpf ole, %23, %24 : vector<128x128xf32>
    %26 = arith.extui %25 : vector<128x128xi1> to vector<128x128xi32>
    %27 = arith.sitofp %26 : vector<128x128xi32> to vector<128x128xf32>
    %28 = arith.truncf %27 : vector<128x128xf32> to vector<128x128xbf16>
    %c0_3 = arith.constant 0 : index
    %c0_4 = arith.constant 0 : index
    %29 = vector.load %arg3[%c0_3, %c0_4] : memref<128x128xbf16, #tpu.memory_space<vmem>>, vector<128x128xbf16>
    tpu.vector_store %arg3[%c0_3, %c0_4], %28 {strides = array<i32>} : memref<128x128xbf16, #tpu.memory_space<vmem>>, vector<128x128xbf16>,
    %c0_i32 = arith.constant 0 : i32
    %c0_5 = arith.constant 0 : index
    %30 = memref.load %arg4[%c0_5] : memref<1xi32, #tpu.memory_space<smem>>
    memref.store %c0_i32, %arg4[%c0_5] : memref<1xi32, #tpu.memory_space<smem>>
    %c0_i32_6 = arith.constant 0 : i32
    %c7_i32 = arith.constant 7 : i32
    %31 = arith.addi %c0_i32_6, %c7_i32 : i32
    %c1_i32 = arith.constant 1 : i32
    scf.for %arg5 = %c0_i32_6 to %31 step %c1_i32  : i32 {
      %c0_14 = arith.constant 0 : index
      %43 = memref.load %arg4[%c0_14] : memref<1xi32, #tpu.memory_space<smem>>
      %c0_i32_15 = arith.constant 0 : i32
      %44 = arith.cmpi eq, %43, %c0_i32_15 : i32
      %45 = arith.extui %44 : i1 to i32
      %c0_i32_16 = arith.constant 0 : i32
      %46 = arith.cmpi ne, %45, %c0_i32_16 : i32
      scf.if %46 {
        %c0_17 = arith.constant 0 : index
        %c0_18 = arith.constant 0 : index
        %47 = vector.load %arg3[%c0_17, %c0_18] : memref<128x128xbf16, #tpu.memory_space<vmem>>, vector<128x128xbf16>
        %cst_19 = arith.constant dense<0.000000e+00> : vector<128x128xf32>
        %48 = tpu.matmul %47, %47, %cst_19 {dimension_numbers = #tpu.dot_dimension_numbers<[1], [0], [0], [1], [0, 0, 1, 1], [], []>} : vector<128x128xbf16>, vector<128x128xbf16>, vector<128x128xf32> -> vector<128x128xf32>
        %cst_20 = arith.constant 0.000000e+00 : f32
        %49 = vector.broadcast %cst_20 : f32 to vector<128x128xf32>
        %50 = arith.cmpf ogt, %48, %49 : vector<128x128xf32>
        %51 = arith.extui %50 : vector<128x128xi1> to vector<128x128xi32>
        %52 = arith.sitofp %51 : vector<128x128xi32> to vector<128x128xf32>
        %53 = arith.truncf %52 : vector<128x128xf32> to vector<128x128xbf16>
        %c0_21 = arith.constant 0 : index
        %c0_22 = arith.constant 0 : index
        %54 = vector.load %arg3[%c0_21, %c0_22] : memref<128x128xbf16, #tpu.memory_space<vmem>>, vector<128x128xbf16>
        tpu.vector_store %arg3[%c0_21, %c0_22], %53 {strides = array<i32>} : memref<128x128xbf16, #tpu.memory_space<vmem>>, vector<128x128xbf16>,
        %55 = arith.cmpf oeq, %53, %47 : vector<128x128xbf16>
        %56 = arith.extui %55 : vector<128x128xi1> to vector<128x128xi32>
        %57 = vector.shape_cast %56 : vector<128x128xi32> to vector<1x128x128xi32>
        %cst_23 = arith.constant dense<2147483647> : vector<1xi32>
        %58 = vector.multi_reduction <minsi>, %57, %cst_23 [1, 2] : vector<1x128x128xi32> to vector<1xi32>
        %59 = vector.shape_cast %58 : vector<1xi32> to vector<1x1x1xi32>
        %60 = vector.extract %59[0, 0, 0] : i32 from vector<1x1x1xi32>
        %c0_24 = arith.constant 0 : index
        %61 = memref.load %arg4[%c0_24] : memref<1xi32, #tpu.memory_space<smem>>
        memref.store %60, %arg4[%c0_24] : memref<1xi32, #tpu.memory_space<smem>>
      } else {
      }
    }
    %c0_7 = arith.constant 0 : index
    %c0_8 = arith.constant 0 : index
    %32 = vector.load %arg3[%c0_7, %c0_8] : memref<128x128xbf16, #tpu.memory_space<vmem>>, vector<128x128xbf16>
    %33 = tpu.iota {dimensions = array<i32: 0>} : vector<128x128xi32>
    %cst_9 = arith.constant 0.000000e+00 : bf16
    %34 = vector.broadcast %cst_9 : bf16 to vector<128x128xbf16>
    %35 = arith.cmpf ogt, %32, %34 : vector<128x128xbf16>
    %c1073741824_i32 = arith.constant 1073741824 : i32
    %36 = vector.broadcast %c1073741824_i32 : i32 to vector<128x128xi32>
    %37 = arith.select %35, %33, %36 : vector<128x128xi1>, vector<128x128xi32>
    %cst_10 = arith.constant dense<2147483647> : vector<128xi32>
    %38 = vector.multi_reduction <minsi>, %37, %cst_10 [0] : vector<128x128xi32> to vector<128xi32>
    %39 = vector.shape_cast %38 : vector<128xi32> to vector<1x128xi32>
    %c0_11 = arith.constant 0 : index
    %c0_12 = arith.constant 0 : index
    %c0_13 = arith.constant 0 : index
    %40 = vector.load %arg2[%c0_11, %c0_12, %c0_13] : memref<1x1x128xi32, #tpu.memory_space<vmem>>, vector<1x1x128xi32>
    %41 = vector.shape_cast %40 : vector<1x1x128xi32> to vector<1x128xi32>
    %42 = vector.shape_cast %39 : vector<1x128xi32> to vector<1x1x128xi32>
    tpu.vector_store %arg2[%c0_11, %c0_12, %c0_13], %42 {strides = array<i32>} : memref<1x1x128xi32, #tpu.memory_space<vmem>>, vector<1x1x128xi32>,
    return
  }
  func.func @transform_0(%arg0: i32) -> (i32, i32, i32) {
    %c0_i32 = arith.constant 0 : i32
    %c0_i32_0 = arith.constant 0 : i32
    %c0_i32_1 = arith.constant 0 : i32
    return %arg0, %c0_i32, %c0_i32_0 : i32, i32, i32
  }
  func.func @transform_1(%arg0: i32) -> (i32, i32, i32) {
    %c0_i32 = arith.constant 0 : i32
    %c0_i32_0 = arith.constant 0 : i32
    %c0_i32_1 = arith.constant 0 : i32
    return %arg0, %c0_i32, %c0_i32_0 : i32, i32, i32
  }
}

</mosaic_0001>

<bundles_post_ra>
// kernel: _run_cc.1
= control target key start
LH: loop header
LB: loop body
LE: loop exit
PB: predicated region body
PF: predicated region fallthrough
CT: control target
= control target key end

     0   :  { %v1378_v2 = vmov 0   ;;  %s1963_s0 = inlined_call_operand.vmem [shape: f32[1,128,8], index: 0, kind: input, shape index: {}]   ;;  %s1964_s1 = inlined_call_operand.hbm [shape: s32[1,1,128], index: 1, kind: output, shape index: {}]  }
   0x1   :  { %v1401_v0 = vld [vmem:[%s1963_s0] sm:$0xff]  ;;  %v1406_v1 = vld [vmem:[%s1963_s0 + $0x10] sm:$0xff]  ;;  %1338 = vset.pattern.permute.xlu2 %v1378_v2  ;;  %1337 = vset.pattern.permute.xlu1 %v1378_v2 }
   0x2   :  { %25 = vxpose.xlu0.b32.start [1/16] (narrow) %v1401_v0, 8  ;;  %69 = vperm.xlu2 %1338, %v1406_v1  }
   0x3   :  { %59 = vperm.xlu1 %1337, %v1401_v0  }
   0x4   :  { %6 = vsyncpa [#allocation5], 0  ;;  %v1414_v3 = vld [vmem:[%s1963_s0 + $0x8] sm:$0xff]  ;;  %v1419_v4 = vld [vmem:[%s1963_s0 + $0x18] sm:$0xff]  ;;  %s1379_s9 = smov 127   ;;  %v1380_v18 = vmov 1  }
   0x5   :  { %v1427_v5 = vld [vmem:[%s1963_s0 + $0x28] sm:$0xff]  ;;  %v1432_v6 = vld [vmem:[%s1963_s0 + $0x20] sm:$0xff]  ;;  %v1440_v7 = vld [vmem:[%s1963_s0 + $0x38] sm:$0xff]  ;;  %v1382_v56 = vmov 2   ;;  %s1383_s10 = smov 0   ;;  %s1793_s11 = smov 0  }
   0x6   :  { %v1445_v8 = vld [vmem:[%s1963_s0 + $0x30] sm:$0xff]  ;;  %v1453_v9 = vld [vmem:[%s1963_s0 + $0x48] sm:$0xff]  ;;  %v1458_v10 = vld [vmem:[%s1963_s0 + $0x40] sm:$0xff]  ;;  %653 = sst [smem:[#allocation3]] %s1383_s10 }
   0x7   :  { %v1466_v11 = vld [vmem:[%s1963_s0 + $0x58] sm:$0xff]  ;;  %v1471_v12 = vld [vmem:[%s1963_s0 + $0x50] sm:$0xff]  ;;  %v1479_v13 = vld [vmem:[%s1963_s0 + $0x68] sm:$0xff] }
   0x8   :  { %v1484_v14 = vld [vmem:[%s1963_s0 + $0x60] sm:$0xff]  ;;  %v1492_v15 = vld [vmem:[%s1963_s0 + $0x78] sm:$0xff]  ;;  %v1497_v16 = vld [vmem:[%s1963_s0 + $0x70] sm:$0xff]  ;;  %s1381_s0 = smov 126  }
   0xa   :  { %26 = vxpose.xlu0.b32.cont [2/16] (narrow) %v1414_v3, 8  ;;  %74 = vperm.xlu2 %1338, %v1419_v4  }
   0xb   :  { %64 = vperm.xlu1 %1337, %v1414_v3  }
  0x12   :  { %27 = vxpose.xlu0.b32.cont [3/16] (narrow) %v1406_v1, 8  ;;  %84 = vperm.xlu2 %1338, %v1427_v5  }
  0x13   :  { %79 = vperm.xlu1 %1337, %v1432_v6  }
  0x1a   :  { %28 = vxpose.xlu0.b32.cont [4/16] (narrow) %v1419_v4, 8  ;;  %94 = vperm.xlu2 %1338, %v1440_v7  }
  0x1b   :  { %89 = vperm.xlu1 %1337, %v1445_v8  }
  0x22   :  { %29 = vxpose.xlu0.b32.cont [5/16] (narrow) %v1432_v6, 8  ;;  %104 = vperm.xlu2 %1338, %v1453_v9  }
  0x23   :  { %99 = vperm.xlu1 %1337, %v1458_v10  }
  0x2a   :  { %30 = vxpose.xlu0.b32.cont [6/16] (narrow) %v1427_v5, 8  ;;  %114 = vperm.xlu2 %1338, %v1466_v11  }
  0x2b   :  { %109 = vperm.xlu1 %1337, %v1471_v12  }
  0x32   :  { %31 = vxpose.xlu0.b32.cont [7/16] (narrow) %v1445_v8, 8  ;;  %124 = vperm.xlu2 %1338, %v1479_v13  }
  0x33   :  { %119 = vperm.xlu1 %1337, %v1484_v14  }
  0x3a   :  { %32 = vxpose.xlu0.b32.cont [8/16] (narrow) %v1440_v7, 8  ;;  %134 = vperm.xlu2 %1338, %v1492_v15  }
  0x3b   :  { %129 = vperm.xlu1 %1337, %v1497_v16  }
  0x42   :  { %33 = vxpose.xlu0.b32.cont [9/16] (narrow) %v1458_v10, 8  ;;  %188 = vrot.lane.b32.xlu2 %v1414_v3, %s1379_s9 }
  0x43   :  { %186 = vrot.lane.b32.xlu1 %v1401_v0, %s1379_s9  ;;  %1340 = vset.pattern.permute.xlu2 %v1380_v18 }
  0x44   :  { %1339 = vset.pattern.permute.xlu1 %v1380_v18 }
  0x4a   :  { %34 = vxpose.xlu0.b32.cont [10/16] (narrow) %v1453_v9, 8  ;;  %192 = vrot.lane.b32.xlu2 %v1419_v4, %s1379_s9 }
  0x4b   :  { %190 = vrot.lane.b32.xlu1 %v1406_v1, %s1379_s9 }
  0x52   :  { %35 = vxpose.xlu0.b32.cont [11/16] (narrow) %v1471_v12, 8  ;;  %196 = vrot.lane.b32.xlu2 %v1427_v5, %s1379_s9 }
  0x53   :  { %194 = vrot.lane.b32.xlu1 %v1432_v6, %s1379_s9 }
  0x5a   :  { %36 = vxpose.xlu0.b32.cont [12/16] (narrow) %v1466_v11, 8  ;;  %200 = vrot.lane.b32.xlu2 %v1440_v7, %s1379_s9 }
  0x5b   :  { %198 = vrot.lane.b32.xlu1 %v1445_v8, %s1379_s9 }
  0x5c   :  { %v1522_v17 = vpop.permute.xlu2 %69 }
  0x62   :  { %37 = vxpose.xlu0.b32.cont [13/16] (narrow) %v1484_v14, 8  ;;  %204 = vrot.lane.b32.xlu2 %v1453_v9, %s1379_s9 }
  0x63   :  { %202 = vrot.lane.b32.xlu1 %v1458_v10, %s1379_s9 }
  0x64   :  { %v1529_v19 = vpop.permute.xlu2 %74 }
  0x6a   :  { %38 = vxpose.xlu0.b32.cont [14/16] (narrow) %v1479_v13, 8  ;;  %208 = vrot.lane.b32.xlu2 %v1466_v11, %s1379_s9 }
  0x6b   :  { %206 = vrot.lane.b32.xlu1 %v1471_v12, %s1379_s9 }
  0x6c   :  { %v1536_v20 = vpop.permute.xlu2 %84 }
  0x72   :  { %39 = vxpose.xlu0.b32.cont [15/16] (narrow) %v1497_v16, 8  ;;  %212 = vrot.lane.b32.xlu2 %v1479_v13, %s1379_s9 }
  0x73   :  { %210 = vrot.lane.b32.xlu1 %v1484_v14, %s1379_s9 }
  0x74   :  { %v1543_v21 = vpop.permute.xlu2 %94 }
  0x75   :  { %v1545_v22 = vpop.permute.xlu1 %59 }
  0x7a   :  { %40 = vxpose.xlu0.b32.end [16/16] (narrow) %v1492_v15, 8  ;;  %216 = vrot.lane.b32.xlu2 %v1492_v15, %s1379_s9 }
  0x7b   :  { %214 = vrot.lane.b32.xlu1 %v1497_v16, %s1379_s9 }
  0x7c   :  { %v1552_v23 = vpop.permute.xlu2 %104 }
  0x7d   :  { %v1554_v24 = vpop.permute.xlu1 %64 }
  0x82   :  { %271 = vperm.xlu2 %1340, %v1414_v3  }
  0x83   :  { %267 = vperm.xlu1 %1339, %v1401_v0  }
  0x84   :  { %v1558_v25 = vpop.permute.xlu2 %114 }
  0x85   :  { %v1560_v26 = vpop.permute.xlu1 %79 }
  0x8a   :  { %279 = vperm.xlu2 %1340, %v1419_v4  }
  0x8b   :  { %275 = vperm.xlu1 %1339, %v1406_v1  }
  0x8c   :  { %v1564_v27 = vpop.permute.xlu2 %124 }
  0x8d   :  { %v1566_v28 = vpop.permute.xlu1 %89 }
  0x92   :  { %287 = vperm.xlu2 %1340, %v1427_v5  }
  0x93   :  { %283 = vperm.xlu1 %1339, %v1432_v6  }
  0x94   :  { %v1570_v29 = vpop.permute.xlu2 %134 }
  0x95   :  { %v1572_v30 = vpop.permute.xlu1 %99 }
  0x9a   :  { %295 = vperm.xlu2 %1340, %v1440_v7  }
  0x9b   :  { %291 = vperm.xlu1 %1339, %v1445_v8  }
  0x9c   :  { %v189_v31 = vpop.permute.xlu2 %188 }
  0x9d   :  { %v1576_v32 = vpop.permute.xlu1 %109 }
  0xa2   :  { %303 = vperm.xlu2 %1340, %v1453_v9  }
  0xa3   :  { %299 = vperm.xlu1 %1339, %v1458_v10  }
  0xa4   :  { %v193_v34 = vpop.permute.xlu2 %192 }
  0xa5   :  { %v1580_v33 = vpop.permute.xlu1 %119 }
  0xaa   :  { %311 = vperm.xlu2 %1340, %v1466_v11  }
  0xab   :  { %307 = vperm.xlu1 %1339, %v1471_v12  }
  0xac   :  { %v197_v36 = vpop.permute.xlu2 %196 }
  0xad   :  { %v1584_v35 = vpop.permute.xlu1 %129 }
  0xb2   :  { %319 = vperm.xlu2 %1340, %v1479_v13  }
  0xb3   :  { %315 = vperm.xlu1 %1339, %v1484_v14  }
  0xb4   :  { %v201_v38 = vpop.permute.xlu2 %200 }
  0xb5   :  { %v187_v37 = vpop.permute.xlu1 %186 }
  0xb6   :  { %234 = vxpose.xlu0.b32.start [1/16] (narrow) %v187_v37, 8 }
  0xba   :  { %327 = vperm.xlu2 %1340, %v1492_v15  }
  0xbb   :  { %323 = vperm.xlu1 %1339, %v1497_v16  }
  0xbc   :  { %v205_v40 = vpop.permute.xlu2 %204 }
  0xbd   :  { %v191_v39 = vpop.permute.xlu1 %190 }
  0xbe   :  { %235 = vxpose.xlu0.b32.cont [2/16] (narrow) %v189_v31, 8 }
  0xc2   :  { %381 = vrot.lane.b32.xlu2 %v1414_v3, %s1381_s0 }
  0xc3   :  { %379 = vrot.lane.b32.xlu1 %v1401_v0, %s1381_s0  ;;  %1342 = vset.pattern.permute.xlu2 %v1382_v56 }
  0xc4   :  { %v209_v43 = vpop.permute.xlu2 %208  ;;  %1341 = vset.pattern.permute.xlu1 %v1382_v56 }
  0xc5   :  { %v195_v41 = vpop.permute.xlu1 %194 }
  0xc6   :  { %236 = vxpose.xlu0.b32.cont [3/16] (narrow) %v191_v39, 8 }
  0xca   :  { %385 = vrot.lane.b32.xlu2 %v1419_v4, %s1381_s0 }
  0xcb   :  { %383 = vrot.lane.b32.xlu1 %v1406_v1, %s1381_s0 }
  0xcc   :  { %v213_v45 = vpop.permute.xlu2 %212 }
  0xcd   :  { %v199_v42 = vpop.permute.xlu1 %198 }
  0xce   :  { %237 = vxpose.xlu0.b32.cont [4/16] (narrow) %v193_v34, 8 }
  0xd2   :  { %389 = vrot.lane.b32.xlu2 %v1427_v5, %s1381_s0 }
  0xd3   :  { %387 = vrot.lane.b32.xlu1 %v1432_v6, %s1381_s0 }
  0xd4   :  { %v217_v47 = vpop.permute.xlu2 %216 }
  0xd5   :  { %v203_v44 = vpop.permute.xlu1 %202 }
  0xd6   :  { %238 = vxpose.xlu0.b32.cont [5/16] (narrow) %v195_v41, 8 }
  0xda   :  { %393 = vrot.lane.b32.xlu2 %v1440_v7, %s1381_s0 }
  0xdb   :  { %391 = vrot.lane.b32.xlu1 %v1445_v8, %s1381_s0 }
  0xdc   :  { %v1614_v49 = vpop.permute.xlu2 %271 }
  0xdd   :  { %v207_v46 = vpop.permute.xlu1 %206 }
  0xde   :  { %239 = vxpose.xlu0.b32.cont [6/16] (narrow) %v197_v36, 8 }
  0xe2   :  { %397 = vrot.lane.b32.xlu2 %v1453_v9, %s1381_s0 }
  0xe3   :  { %395 = vrot.lane.b32.xlu1 %v1458_v10, %s1381_s0 }
  0xe4   :  { %v1622_v52 = vpop.permute.xlu2 %279 }
  0xe5   :  { %v211_v48 = vpop.permute.xlu1 %210 }
  0xe6   :  { %240 = vxpose.xlu0.b32.cont [7/16] (narrow) %v199_v42, 8 }
  0xea   :  { %401 = vrot.lane.b32.xlu2 %v1466_v11, %s1381_s0 }
  0xeb   :  { %399 = vrot.lane.b32.xlu1 %v1471_v12, %s1381_s0 }
  0xec   :  { %v1630_v54 = vpop.permute.xlu2 %287 }
  0xed   :  { %v215_v50 = vpop.permute.xlu1 %214 }
  0xee   :  { %241 = vxpose.xlu0.b32.cont [8/16] (narrow) %v201_v38, 8 }
  0xf2   :  { %405 = vrot.lane.b32.xlu2 %v1479_v13, %s1381_s0 }
  0xf3   :  { %403 = vrot.lane.b32.xlu1 %v1484_v14, %s1381_s0 }
  0xf4   :  { %v1638_v57 = vpop.permute.xlu2 %295 }
  0xf5   :  { %v1620_v51 = vpop.permute.xlu1 %267 }
  0xf6   :  { %242 = vxpose.xlu0.b32.cont [9/16] (narrow) %v203_v44, 8 }
  0xfa   :  { %409 = vrot.lane.b32.xlu2 %v1492_v15, %s1381_s0 }
  0xfb   :  { %407 = vrot.lane.b32.xlu1 %v1497_v16, %s1381_s0 }
  0xfc   :  { %v1644_v59 = vpop.permute.xlu2 %303 }
  0xfd   :  { %v1628_v53 = vpop.permute.xlu1 %275 }
  0xfe   :  { %243 = vxpose.xlu0.b32.cont [10/16] (narrow) %v205_v40, 8 }
 0x102   :  { %464 = vperm.xlu2 %1342, %v1414_v3  }
 0x103   :  { %460 = vperm.xlu1 %1341, %v1401_v0  }
 0x104   :  { %v1650_v62 = vpop.permute.xlu2 %311 }
 0x105   :  { %v1632_v55 = vpop.permute.xlu1 %283 }
 0x106   :  { %244 = vxpose.xlu0.b32.cont [11/16] (narrow) %v207_v46, 8 }
 0x10a   :  { %472 = vperm.xlu2 %1342, %v1419_v4  }
 0x10b   :  { %468 = vperm.xlu1 %1341, %v1406_v1  }
 0x10c   :  { %v1656_v0 = vpop.permute.xlu2 %319 }
 0x10d   :  { %v1640_v58 = vpop.permute.xlu1 %291 }
 0x10e   :  { %245 = vxpose.xlu0.b32.cont [12/16] (narrow) %v209_v43, 8 }
 0x112   :  { %480 = vperm.xlu2 %1342, %v1427_v5  }
 0x113   :  { %476 = vperm.xlu1 %1341, %v1432_v6  }
 0x114   :  { %v1660_v2 = vpop.permute.xlu2 %327 }
 0x115   :  { %v1646_v60 = vpop.permute.xlu1 %299 }
 0x116   :  { %246 = vxpose.xlu0.b32.cont [13/16] (narrow) %v211_v48, 8 }
 0x11a   :  { %488 = vperm.xlu2 %1342, %v1440_v7   ;;  %v41_v7 = vpop.trf.xlu0 }
 0x11b   :  { %484 = vperm.xlu1 %1341, %v1445_v8  }
 0x11c   :  { %v382_v4 = vpop.permute.xlu2 %381 }
 0x11d   :  { %v308_v61 = vpop.permute.xlu1 %307 }
 0x11e   :  { %247 = vxpose.xlu0.b32.cont [14/16] (narrow) %v213_v45, 8 }
 0x122   :  { %496 = vperm.xlu2 %1342, %v1453_v9  }
 0x123   :  { %492 = vperm.xlu1 %1341, %v1458_v10  }
 0x124   :  { %v386_v6 = vpop.permute.xlu2 %385 }
 0x125   :  { %v316_v63 = vpop.permute.xlu1 %315 }
 0x126   :  { %248 = vxpose.xlu0.b32.cont [15/16] (narrow) %v215_v50, 8 }
 0x12a   :  { %504 = vperm.xlu2 %1342, %v1466_v11  }
 0x12b   :  { %500 = vperm.xlu1 %1341, %v1471_v12   ;;  %v1668_v12 = vperm.slane %v41_v7, 0 }
 0x12c   :  { %v390_v11 = vpop.permute.xlu2 %389 }
 0x12d   :  { %v324_v1 = vpop.permute.xlu1 %323  ;;  %v150_v18 = vsub.f32 %v1580_v33, %v1668_v12  ;;  %v152_v31 = vsub.f32 %v1584_v35, %v1668_v12 }
 0x12e   :  { %249 = vxpose.xlu0.b32.end [16/16] (narrow) %v217_v47, 8 }
 0x12f   :  { %v166_v40 = vmul.f32 %v150_v18, %v150_v18  ;;  %v168_v41 = vmul.f32 %v152_v31, %v152_v31  ;;  %v140_v18 = vsub.f32 %v1522_v17, %v1668_v12  ;;  %v141_v31 = vsub.f32 %v1529_v19, %v1668_v12 }
 0x130   :  { %v147_v17 = vsub.f32 %v1552_v23, %v1668_v12  ;;  %v149_v19 = vsub.f32 %v1558_v25, %v1668_v12 }
 0x132   :  { %512 = vperm.xlu2 %1342, %v1479_v13  }
 0x133   :  { %508 = vperm.xlu1 %1341, %v1484_v14  }
 0x135   :  { %v380_v3 = vpop.permute.xlu1 %379 }
 0x136   :  { %427 = vxpose.xlu0.b32.start [1/16] (narrow) %v380_v3, 8 }
 0x13a   :  { %520 = vperm.xlu2 %1342, %v1492_v15  }
 0x13b   :  { %516 = vperm.xlu1 %1341, %v1497_v16   ;;  %v148_v16 = vsub.f32 %v1576_v32, %v1668_v12  ;;  %v394_v32 = vpop.permute.xlu2 %393 }
 0x13d   :  { %v384_v5 = vpop.permute.xlu1 %383  ;;  %v164_v39 = vmul.f32 %v148_v16, %v148_v16 }
 0x13e   :  { %428 = vxpose.xlu0.b32.cont [2/16] (narrow) %v382_v4, 8 }
 0x143   :  { %v398_v33 = vpop.permute.xlu2 %397 }
 0x145   :  { %v388_v8 = vpop.permute.xlu1 %387 }
 0x146   :  { %429 = vxpose.xlu0.b32.cont [3/16] (narrow) %v384_v5, 8 }
 0x14b   :  { %v402_v35 = vpop.permute.xlu2 %401 }
 0x14d   :  { %v392_v36 = vpop.permute.xlu1 %391 }
 0x14e   :  { %430 = vxpose.xlu0.b32.cont [4/16] (narrow) %v386_v6, 8 }
 0x153   :  { %v406_v47 = vpop.permute.xlu2 %405 }
 0x155   :  { %v396_v45 = vpop.permute.xlu1 %395 }
 0x156   :  { %431 = vxpose.xlu0.b32.cont [5/16] (narrow) %v388_v8, 8 }
 0x15a   :  { %v250_v9 = vpop.trf.xlu0 }
 0x15b   :  { %v1666_v10 = vperm.slane %v250_v9, 0  ;;  %v410_v50 = vpop.permute.xlu2 %409 }
 0x15d   :  { %v341_v13 = vsub.f32 %v308_v61, %v1666_v10  ;;  %v343_v14 = vsub.f32 %v316_v63, %v1666_v10  ;;  %v345_v15 = vsub.f32 %v324_v1, %v1666_v10  ;;  %v400_v46 = vpop.permute.xlu1 %399  ;;  %v332_v23 = vsub.f32 %v1614_v49, %v1666_v10 }
 0x15e   :  { %432 = vxpose.xlu0.b32.cont [6/16] (narrow) %v390_v11, 8  ;;  %v333_v25 = vsub.f32 %v1628_v53, %v1666_v10  ;;  %v339_v49 = vsub.f32 %v1646_v60, %v1666_v10  ;;  %v340_v53 = vsub.f32 %v1644_v59, %v1666_v10 }
 0x15f   :  { %v357_v34 = vmul.f32 %v341_v13, %v341_v13  ;;  %v359_v37 = vmul.f32 %v343_v14, %v343_v14  ;;  %v361_v38 = vmul.f32 %v345_v15, %v345_v15  ;;  %v138_v13 = vsub.f32 %v1545_v22, %v1668_v12 }
 0x160   :  { %v139_v14 = vsub.f32 %v1554_v24, %v1668_v12  ;;  %v144_v22 = vsub.f32 %v1566_v28, %v1668_v12  ;;  %v145_v24 = vsub.f32 %v1543_v21, %v1668_v12 }
 0x161   :  { %v1679_v42 = vadd.f32 %v357_v34, %v164_v39  ;;  %v1681_v43 = vadd.f32 %v359_v37, %v166_v40  ;;  %v1683_v44 = vadd.f32 %v361_v38, %v168_v41  ;;  %v142_v34 = vsub.f32 %v1560_v26, %v1668_v12 }
 0x162   :  { %v146_v37 = vsub.f32 %v1572_v30, %v1668_v12  ;;  %v151_v26 = vsub.f32 %v1564_v27, %v1668_v12  ;;  %v154_v38 = vmul.f32 %v138_v13, %v138_v13  ;;  %v155_v28 = vmul.f32 %v139_v14, %v139_v14 }
 0x163   :  { %v1685_v63 = vpop.permute.xlu2 %464  ;;  %v156_v39 = vmul.f32 %v140_v18, %v140_v18  ;;  %v157_v40 = vmul.f32 %v141_v31, %v141_v31  ;;  %v158_v21 = vmul.f32 %v142_v34, %v142_v34  ;;  %v331_v30 = vsub.f32 %v1620_v51, %v1666_v10 }
 0x164   :  { %v334_v27 = vsub.f32 %v1622_v52, %v1666_v10  ;;  %v338_v51 = vsub.f32 %v1638_v57, %v1666_v10  ;;  %v162_v52 = vmul.f32 %v146_v37, %v146_v37  ;;  %v349_v57 = vmul.f32 %v333_v25, %v333_v25 }
 0x165   :  { %v404_v48 = vpop.permute.xlu1 %403  ;;  %v165_v14 = vmul.f32 %v149_v19, %v149_v19  ;;  %v355_v31 = vmul.f32 %v339_v49, %v339_v49  ;;  %v167_v34 = vmul.f32 %v151_v26, %v151_v26 }
 0x166   :  { %433 = vxpose.xlu0.b32.cont [7/16] (narrow) %v392_v36, 8  ;;  %v143_v36 = vsub.f32 %v1536_v20, %v1668_v12  ;;  %v153_v20 = vsub.f32 %v1570_v29, %v1668_v12  ;;  %v335_v29 = vsub.f32 %v1632_v55, %v1666_v10  ;;  %v336_v12 = vsub.f32 %v1630_v54, %v1666_v10 }
 0x167   :  { %v342_v55 = vsub.f32 %v1650_v62, %v1666_v10  ;;  %v344_v54 = vsub.f32 %v1656_v0, %v1666_v10  ;;  %v350_v60 = vmul.f32 %v334_v27, %v334_v27  ;;  %v354_v18 = vmul.f32 %v338_v51, %v338_v51 }
 0x168   :  { %v159_v41 = vmul.f32 %v143_v36, %v143_v36  ;;  %v352_v13 = vmul.f32 %v336_v12, %v336_v12  ;;  %v356_v62 = vmul.f32 %v340_v53, %v340_v53  ;;  %v365_v37 = vadd.f32 %v349_v57, %v156_v39 }
 0x169   :  { %v358_v36 = vmul.f32 %v342_v55, %v342_v55  ;;  %v360_v0 = vmul.f32 %v344_v54, %v344_v54  ;;  %v371_v12 = vadd.f32 %v355_v31, %v162_v52 }
 0x16b   :  { %v1689_v3 = vpop.permute.xlu2 %472  ;;  %v374_v51 = vadd.f32 %v358_v36, %v165_v14  ;;  %v376_v49 = vadd.f32 %v360_v0, %v167_v34 }
 0x16d   :  { %v408_v61 = vpop.permute.xlu1 %407 }
 0x16e   :  { %434 = vxpose.xlu0.b32.cont [8/16] (narrow) %v394_v32, 8  ;;  %v160_v32 = vmul.f32 %v144_v22, %v144_v22 }
 0x173   :  { %v1693_v5 = vpop.permute.xlu2 %480 }
 0x175   :  { %v1687_v1 = vpop.permute.xlu1 %460 }
 0x176   :  { %435 = vxpose.xlu0.b32.cont [9/16] (narrow) %v396_v45, 8  ;;  %v161_v45 = vmul.f32 %v145_v24, %v145_v24  ;;  %v169_v24 = vmul.f32 %v153_v20, %v153_v20 }
 0x17b   :  { %v1697_v7 = vpop.permute.xlu2 %488 }
 0x17d   :  { %v1691_v4 = vpop.permute.xlu1 %468 }
 0x17e   :  { %436 = vxpose.xlu0.b32.cont [10/16] (narrow) %v398_v33, 8  ;;  %v337_v33 = vsub.f32 %v1640_v58, %v1666_v10  ;;  %v346_v58 = vsub.f32 %v1660_v2, %v1666_v10 }
 0x180   :  { %v353_v59 = vmul.f32 %v337_v33, %v337_v33  ;;  %v362_v22 = vmul.f32 %v346_v58, %v346_v58 }
 0x182   :  { %v369_v25 = vadd.f32 %v353_v59, %v160_v32  ;;  %v378_v53 = vadd.f32 %v362_v22, %v169_v24 }
 0x183   :  { %v1701_v9 = vpop.permute.xlu2 %496 }
 0x185   :  { %v1695_v6 = vpop.permute.xlu1 %476 }
 0x186   :  { %437 = vxpose.xlu0.b32.cont [11/16] (narrow) %v400_v46, 8  ;;  %v347_v46 = vmul.f32 %v331_v30, %v331_v30 }
 0x188   :  { %v363_v2 = vadd.f32 %v347_v46, %v154_v38 }
 0x18b   :  { %v1709_v15 = vpop.permute.xlu2 %504 }
 0x18d   :  { %v1699_v8 = vpop.permute.xlu1 %484 }
 0x18e   :  { %438 = vxpose.xlu0.b32.cont [12/16] (narrow) %v402_v35, 8  ;;  %v163_v35 = vmul.f32 %v147_v17, %v147_v17  ;;  %v366_v17 = vadd.f32 %v350_v60, %v157_v40 }
 0x190   :  { %v372_v33 = vadd.f32 %v356_v62, %v163_v35 }
 0x195   :  { %v1703_v11 = vpop.permute.xlu1 %492 }
 0x196   :  { %439 = vxpose.xlu0.b32.cont [13/16] (narrow) %v404_v48, 8  ;;  %v513_v48 = vpop.permute.xlu2 %512 }
 0x19d   :  { %v1711_v16 = vpop.permute.xlu1 %500 }
 0x19e   :  { %440 = vxpose.xlu0.b32.cont [14/16] (narrow) %v406_v47, 8  ;;  %v348_v47 = vmul.f32 %v332_v23, %v332_v23  ;;  %v368_v23 = vadd.f32 %v352_v13, %v159_v41  ;;  %v521_v41 = vpop.permute.xlu2 %520 }
 0x1a0   :  { %v364_v10 = vadd.f32 %v348_v47, %v155_v28 }
 0x1a6   :  { %441 = vxpose.xlu0.b32.cont [15/16] (narrow) %v408_v61, 8  ;;  %v351_v61 = vmul.f32 %v335_v29, %v335_v29  ;;  %v370_v29 = vadd.f32 %v354_v18, %v161_v45 }
 0x1a8   :  { %v367_v30 = vadd.f32 %v351_v61, %v158_v21 }
 0x1ae   :  { %442 = vxpose.xlu0.b32.end [16/16] (narrow) %v410_v50, 8  ;;  %v509_v50 = vpop.permute.xlu1 %508 }
 0x1b6   :  { %v517_v32 = vpop.permute.xlu1 %516 }
 0x1da   :  { %v443_v27 = vpop.trf.xlu0 }
 0x1db   :  { %v523_v19 = vperm.slane %v443_v27, 0 }
 0x1dd   :  { %v524_v26 = vsub.f32 %v1687_v1, %v523_v19  ;;  %v525_v55 = vsub.f32 %v1685_v63, %v523_v19  ;;  %v526_v20 = vsub.f32 %v1691_v4, %v523_v19  ;;  %v527_v38 = vsub.f32 %v1689_v3, %v523_v19 }
 0x1de   :  { %v528_v28 = vsub.f32 %v1695_v6, %v523_v19  ;;  %v529_v39 = vsub.f32 %v1693_v5, %v523_v19  ;;  %v530_v40 = vsub.f32 %v1699_v8, %v523_v19  ;;  %v531_v21 = vsub.f32 %v1697_v7, %v523_v19 }
 0x1df   :  { %v532_v45 = vsub.f32 %v1703_v11, %v523_v19  ;;  %v533_v1 = vsub.f32 %v1701_v9, %v523_v19  ;;  %v534_v63 = vsub.f32 %v1711_v16, %v523_v19  ;;  %v535_v4 = vsub.f32 %v1709_v15, %v523_v19 }
 0x1e0   :  { %v536_v52 = vsub.f32 %v509_v50, %v523_v19  ;;  %v537_v3 = vsub.f32 %v513_v48, %v523_v19  ;;  %v538_v54 = vsub.f32 %v517_v32, %v523_v19  ;;  %v539_v6 = vsub.f32 %v521_v41, %v523_v19 }
 0x1e1   :  { %v540_v58 = vmul.f32 %v524_v26, %v524_v26  ;;  %v541_v5 = vmul.f32 %v525_v55, %v525_v55  ;;  %v542_v35 = vmul.f32 %v526_v20, %v526_v20  ;;  %v543_v8 = vmul.f32 %v527_v38, %v527_v38 }
 0x1e2   :  { %v544_v46 = vmul.f32 %v528_v28, %v528_v28  ;;  %v545_v7 = vmul.f32 %v529_v39, %v529_v39  ;;  %v546_v47 = vmul.f32 %v530_v40, %v530_v40  ;;  %v547_v57 = vmul.f32 %v531_v21, %v531_v21 }
 0x1e3   :  { %v548_v60 = vmul.f32 %v532_v45, %v532_v45  ;;  %v549_v11 = vmul.f32 %v533_v1, %v533_v1  ;;  %v550_v61 = vmul.f32 %v534_v63, %v534_v63  ;;  %v551_v9 = vmul.f32 %v535_v4, %v535_v4 }
 0x1e4   :  { %v552_v13 = vmul.f32 %v536_v52, %v536_v52  ;;  %v553_v16 = vmul.f32 %v537_v3, %v537_v3  ;;  %v554_v59 = vmul.f32 %v538_v54, %v538_v54  ;;  %v555_v15 = vmul.f32 %v539_v6, %v539_v6 }
 0x1e5   :  { %v556_v50 = vadd.f32 %v540_v58, %v363_v2  ;;  %v557_v48 = vadd.f32 %v541_v5, %v364_v10  ;;  %v558_v14 = vadd.f32 %v542_v35, %v365_v37  ;;  %v559_v18 = vadd.f32 %v543_v8, %v366_v17 }
 0x1e6   :  { %v560_v31 = vadd.f32 %v544_v46, %v367_v30  ;;  %v561_v62 = vadd.f32 %v545_v7, %v368_v23  ;;  %v562_v34 = vadd.f32 %v546_v47, %v369_v25  ;;  %v563_v36 = vadd.f32 %v547_v57, %v370_v29 }
 0x1e7   :  { %v564_v0 = vadd.f32 %v548_v60, %v371_v12  ;;  %v565_v22 = vadd.f32 %v549_v11, %v372_v33  ;;  %v566_v24 = vadd.f32 %v550_v61, %v1679_v42  ;;  %v567_v27 = vadd.f32 %v551_v9, %v374_v51 }
 0x1e8   :  { %v568_v19 = vadd.f32 %v552_v13, %v1681_v43  ;;  %v569_v26 = vadd.f32 %v553_v16, %v376_v49  ;;  %v570_v55 = vadd.f32 %v554_v59, %v1683_v44  ;;  %v571_v20 = vadd.f32 %v555_v15, %v378_v53 }
 0x1e9   :  { %vm572_vm0 = vcmp.le.f32.partialorder %v556_v50, 1.0  ;;  %vm573_vm1 = vcmp.le.f32.partialorder %v557_v48, 1.0  ;;  %vm574_vm2 = vcmp.le.f32.partialorder %v558_v14, 1.0  ;;  %vm575_vm3 = vcmp.le.f32.partialorder %v559_v18, 1.0 }
 0x1ea   :  { %vm576_vm4 = vcmp.le.f32.partialorder %v560_v31, 1.0  ;;  %vm577_vm5 = vcmp.le.f32.partialorder %v561_v62, 1.0  ;;  %vm578_vm6 = vcmp.le.f32.partialorder %v562_v34, 1.0  ;;  %vm579_vm7 = vcmp.le.f32.partialorder %v563_v36, 1.0 }
 0x1eb   :  { %vm580_vm8 = vcmp.le.f32.partialorder %v564_v0, 1.0  ;;  %vm581_vm9 = vcmp.le.f32.partialorder %v565_v22, 1.0  ;;  %vm582_vm10 = vcmp.le.f32.partialorder %v566_v24, 1.0  ;;  %vm583_vm11 = vcmp.le.f32.partialorder %v567_v27, 1.0 }
 0x1ec   :  { %vm584_vm12 = vcmp.le.f32.partialorder %v568_v19, 1.0  ;;  %vm585_vm13 = vcmp.le.f32.partialorder %v569_v26, 1.0  ;;  %vm586_vm14 = vcmp.le.f32.partialorder %v570_v55, 1.0  ;;  %vm587_vm15 = vcmp.le.f32.partialorder %v571_v20, 1.0 }
 0x1ed   :  { %v1384_v42 = vmov 0.0  }
 0x1ee   :  { %v1119_v43 = vsel %vm572_vm0, 1.0, %v1384_v42  ;;  %v1120_v44 = vsel %vm573_vm1, 1.0, %v1384_v42  ;;  %v1121_v2 = vsel %vm574_vm2, 1.0, %v1384_v42  ;;  %v1122_v10 = vsel %vm575_vm3, 1.0, %v1384_v42 }
 0x1ef   :  { %v1123_v37 = vsel %vm576_vm4, 1.0, %v1384_v42  ;;  %v1124_v17 = vsel %vm577_vm5, 1.0, %v1384_v42  ;;  %v1125_v30 = vsel %vm578_vm6, 1.0, %v1384_v42  ;;  %v1126_v23 = vsel %vm579_vm7, 1.0, %v1384_v42 }
 0x1f0   :  { %v1127_v25 = vsel %vm580_vm8, 1.0, %v1384_v42  ;;  %v1128_v29 = vsel %vm581_vm9, 1.0, %v1384_v42  ;;  %v1129_v12 = vsel %vm582_vm10, 1.0, %v1384_v42  ;;  %v1130_v33 = vsel %vm583_vm11, 1.0, %v1384_v42 }
 0x1f1   :  { %v1131_v51 = vsel %vm584_vm12, 1.0, %v1384_v42  ;;  %v1132_v49 = vsel %vm585_vm13, 1.0, %v1384_v42  ;;  %v1133_v53 = vsel %vm586_vm14, 1.0, %v1384_v42  ;;  %v1134_v38 = vsel %vm587_vm15, 1.0, %v1384_v42 }
 0x1f2   :  { %v1193_v28 = vpack.c.bf16 %v1120_v44, %v1119_v43  ;;  %v1196_v39 = vpack.c.bf16 %v1122_v10, %v1121_v2  ;;  %v1199_v40 = vpack.c.bf16 %v1124_v17, %v1123_v37  ;;  %v1202_v21 = vpack.c.bf16 %v1126_v23, %v1125_v30 }
 0x1f3   :  { %v1205_v41 = vpack.c.bf16 %v1128_v29, %v1127_v25  ;;  %v1208_v32 = vpack.c.bf16 %v1130_v33, %v1129_v12  ;;  %v1211_v45 = vpack.c.bf16 %v1132_v49, %v1131_v51  ;;  %v1214_v1 = vpack.c.bf16 %v1134_v38, %v1133_v53 }
 0x1f4   :  { %1194 = vst [vmem:[#allocation2] sm:$0xff] %v1193_v28  }
 0x1f5   :  { %1272 = vst [vmem:[#allocation2 + $0x8] sm:$0xff] %v1196_v39  }
 0x1f6   :  { %1273 = vst [vmem:[#allocation2 + $0x10] sm:$0xff] %v1199_v40  }
 0x1f7   :  { %1274 = vst [vmem:[#allocation2 + $0x18] sm:$0xff] %v1202_v21  }
 0x1f8   :  { %1275 = vst [vmem:[#allocation2 + $0x20] sm:$0xff] %v1205_v41  }
 0x1f9   :  { %1276 = vst [vmem:[#allocation2 + $0x28] sm:$0xff] %v1208_v32  }
 0x1fa   :  { %1277 = vst [vmem:[#allocation2 + $0x30] sm:$0xff] %v1211_v45  }
 0x1fb   :  { %1278 = vst [vmem:[#allocation2 + $0x38] sm:$0xff] %v1214_v1  }
 0x215   :  { %1343 = vset.pattern.permute.xlu0 %v1382_v56 }
 0x216 LB: > { %s660_s12 = sld [smem:[#allocation3]]  ;;  %s1376_s11 = sphi %s1793_s11, %s659_s11  }
 0x21c   : > { %p1135_p0 = scmp.ne.s32.totalorder %s660_s12, 0 }
 0x21e   : > { %664 = sbr.rel (%p1135_p0) target bundleno = 1053 (0x41d), region = 16 }
 0x223   : > { %v1191_v63 = vld [vmem:[#allocation2 + $0x38] sm:$0xff]  ;;  %v1190_v4 = vld [vmem:[#allocation2 + $0x30] sm:$0xff]  ;;  %v1189_v52 = vld [vmem:[#allocation2 + $0x28] sm:$0xff]  ;;  %v1385_v57 = vmov 0.0   ;;  %v1386_v34 = vmov 0  }
 0x224   : > { %729 = vmatpush.bf16.msra.mxu0 %v1191_v63  ;;  %1293 = vmatpush.bf16.msra.mxu1 %v1191_v63  ;;  %v1188_v56 = vld [vmem:[#allocation2 + $0x20] sm:$0xff]  ;;  %v1187_v3 = vld [vmem:[#allocation2 + $0x18] sm:$0xff]  ;;  %v1186_v54 = vld [vmem:[#allocation2 + $0x10] sm:$0xff] }
 0x225   : > { %1294 = vmatpush.bf16.msra.mxu2 %v1191_v63  ;;  %1295 = vmatpush.bf16.msra.mxu3 %v1191_v63  ;;  %v1185_v6 = vld [vmem:[#allocation2 + $0x8] sm:$0xff]  ;;  %v1184_v58 = vld [vmem:[#allocation2] sm:$0xff]  ;;  %v669_v46 = vld [vmem:[#allocation2 + $0x10] sm:$0xff]  }
 0x226   : > { %v665_v8 = vld [vmem:[#allocation2] sm:$0xff]   ;;  %v878_v47 = vunpack.c.l.bf16 %v669_v46  ;;  %v1802_v48 = vld [vmem:[#allocation2 + $0x30] sm:$0xff]   ;;  %v879_v31 = vunpack.c.h.bf16 %v669_v46  ;;  %v1804_v62 = vld [vmem:[#allocation2 + $0x8] sm:$0xff]  }
 0x227   : > { %v874_v7 = vunpack.c.l.bf16 %v665_v8  ;;  %v673_v59 = vld [vmem:[#allocation2 + $0x20] sm:$0xff]   ;;  %v875_v18 = vunpack.c.h.bf16 %v665_v8  ;;  %v1808_v27 = vld [vmem:[#allocation2 + $0x18] sm:$0xff]   ;;  %v886_v26 = vunpack.c.l.bf16 %v1802_v48  ;;  %v876_v20 = vunpack.c.l.bf16 %v1804_v62  ;;  %v1825_v53 = vld [vmem:[#allocation2 + $0x28] sm:$0xff]  }
 0x228   : > { %730 = vmatpush.bf16.msra.mxu0 %v1190_v4  ;;  %1296 = vmatpush.bf16.msra.mxu1 %v1190_v4  ;;  %v882_v22 = vunpack.c.l.bf16 %v673_v59  ;;  %v883_v55 = vunpack.c.h.bf16 %v673_v59  ;;  %v880_v44 = vunpack.c.l.bf16 %v1808_v27  ;;  %v1827_v38 = vld [vmem:[#allocation2 + $0x38] sm:$0xff]   ;;  %v887_v32 = vunpack.c.h.bf16 %v1802_v48 }
 0x229   : > { %1297 = vmatpush.bf16.msra.mxu2 %v1190_v4  ;;  %1298 = vmatpush.bf16.msra.mxu3 %v1190_v4  ;;  %v884_v45 = vunpack.c.l.bf16 %v1825_v53  ;;  %v888_v1 = vunpack.c.l.bf16 %v1827_v38  ;;  %v885_v59 = vunpack.c.h.bf16 %v1825_v53 }
 0x22c   : > { %731 = vmatpush.bf16.msra.mxu0 %v1189_v52  ;;  %1299 = vmatpush.bf16.msra.mxu1 %v1189_v52 }
 0x22d   : > { %1300 = vmatpush.bf16.msra.mxu2 %v1189_v52  ;;  %1301 = vmatpush.bf16.msra.mxu3 %v1189_v52 }
 0x230   : > { %732 = vmatpush.bf16.msra.mxu0 %v1188_v56  ;;  %1302 = vmatpush.bf16.msra.mxu1 %v1188_v56 }
 0x231   : > { %1303 = vmatpush.bf16.msra.mxu2 %v1188_v56  ;;  %1304 = vmatpush.bf16.msra.mxu3 %v1188_v56 }
 0x234   : > { %733 = vmatpush.bf16.msra.mxu0 %v1187_v3  ;;  %1305 = vmatpush.bf16.msra.mxu1 %v1187_v3 }
 0x235   : > { %1306 = vmatpush.bf16.msra.mxu2 %v1187_v3  ;;  %1307 = vmatpush.bf16.msra.mxu3 %v1187_v3 }
 0x238   : > { %734 = vmatpush.bf16.msra.mxu0 %v1186_v54  ;;  %1308 = vmatpush.bf16.msra.mxu1 %v1186_v54 }
 0x239   : > { %1309 = vmatpush.bf16.msra.mxu2 %v1186_v54  ;;  %1310 = vmatpush.bf16.msra.mxu3 %v1186_v54 }
 0x23c   : > { %735 = vmatpush.bf16.msra.mxu0 %v1185_v6  ;;  %1311 = vmatpush.bf16.msra.mxu1 %v1185_v6 }
 0x23d   : > { %1312 = vmatpush.bf16.msra.mxu2 %v1185_v6  ;;  %1313 = vmatpush.bf16.msra.mxu3 %v1185_v6 }
 0x240   : > { %736 = vmatpush.bf16.msra.mxu0 %v1184_v58  ;;  %1314 = vmatpush.bf16.msra.mxu1 %v1184_v58 }
 0x241   : > { %1315 = vmatpush.bf16.msra.mxu2 %v1184_v58  ;;  %1316 = vmatpush.bf16.msra.mxu3 %v1184_v58 }
 0x243   : > { %737 = vmatmul.bf16.vlgmr.msra.gmra.mxu0 %v1184_v58  ;;  %747 = vmatmul.bf16.vlgmr.msra.gmra.mxu1 %v1186_v54 }
 0x244   : > { %757 = vmatmul.bf16.vlgmr.msra.gmra.mxu2 %v1188_v56  ;;  %767 = vmatmul.bf16.vlgmr.msra.gmra.mxu3 %v1190_v4  ;;  %v877_v56 = vunpack.c.h.bf16 %v1804_v62 }
 0x253   : > { %742 = vmatmul.bf16.gmra.mxu0 %v1185_v6  ;;  %752 = vmatmul.bf16.gmra.mxu1 %v1187_v3  ;;  %v881_v3 = vunpack.c.h.bf16 %v1808_v27 }
 0x254   : > { %762 = vmatmul.bf16.gmra.mxu2 %v1189_v52  ;;  %772 = vmatmul.bf16.gmra.mxu3 %v1191_v63 }
 0x2c0   : > { %v738_v5 = vpop.f32.mrf.mxu0  ;;  %v748_v35 = vpop.f32.mrf.mxu1 }
 0x2c1   : > { %vm778_vm0 = vcmp.gt.f32.partialorder %v738_v5, 0.0  ;;  %vm782_vm1 = vcmp.gt.f32.partialorder %v748_v35, 0.0 }
 0x2c2   : > { %v1168_v60 = vsel %vm778_vm0, 1.0, %v1385_v57  ;;  %v1172_v11 = vsel %vm782_vm1, 1.0, %v1385_v57 }
 0x2c3   : > { %vm890_vm2 = vcmp.eq.f32.partialorder %v1168_v60, %v874_v7  ;;  %vm894_vm3 = vcmp.eq.f32.partialorder %v1172_v11, %v878_v47 }
 0x2c4   : > { %v906_v36 = vsel %vm890_vm2, 1, %v1386_v34  ;;  %v910_v0 = vsel %vm894_vm3, 1, %v1386_v34 }
 0x2c5   : > { %vm922_vm8 = vcmp.lt.s32.totalorder %v906_v36, %v910_v0 }
 0x2c6   : > { %v923_v28 = vsel %vm922_vm8, %v906_v36, %v910_v0 }
 0x2c7   : > { %v758_v61 = vpop.f32.mrf.mxu2  ;;  %v768_v9 = vpop.f32.mrf.mxu3 }
 0x2c8   : > { %v740_v13 = vpop.f32.mrf.mxu0  ;;  %v750_v16 = vpop.f32.mrf.mxu1  ;;  %vm786_vm6 = vcmp.gt.f32.partialorder %v758_v61, 0.0  ;;  %vm790_vm7 = vcmp.gt.f32.partialorder %v768_v9, 0.0 }
 0x2c9   : > { %vm779_vm4 = vcmp.gt.f32.partialorder %v740_v13, 0.0  ;;  %vm783_vm5 = vcmp.gt.f32.partialorder %v750_v16, 0.0  ;;  %v1176_v19 = vsel %vm786_vm6, 1.0, %v1385_v57  ;;  %v1180_v10 = vsel %vm790_vm7, 1.0, %v1385_v57 }
 0x2ca   : > { %v1169_v15 = vsel %vm779_vm4, 1.0, %v1385_v57  ;;  %v1173_v50 = vsel %vm783_vm5, 1.0, %v1385_v57  ;;  %vm1814_vm11 = vcmp.eq.f32.partialorder %v1176_v19, %v882_v22  ;;  %vm902_vm1 = vcmp.eq.f32.partialorder %v1180_v10, %v886_v26 }
 0x2cb   : > { %v1217_v14 = vpack.c.bf16 %v1169_v15, %v1168_v60  ;;  %v1223_v24 = vpack.c.bf16 %v1173_v50, %v1172_v11  ;;  %vm891_vm9 = vcmp.eq.f32.partialorder %v1169_v15, %v875_v18  ;;  %vm895_vm10 = vcmp.eq.f32.partialorder %v1173_v50, %v879_v31 }
 0x2cc   : > { %v907_v25 = vsel %vm891_vm9, 1, %v1386_v34  ;;  %v911_v29 = vsel %vm895_vm10, 1, %v1386_v34  ;;  %v914_v39 = vsel %vm1814_vm11, 1, %v1386_v34  ;;  %v918_v63 = vsel %vm902_vm1, 1, %v1386_v34 }
 0x2cd   : > { %1218 = vst [vmem:[#allocation2] sm:$0xff] %v1217_v14   ;;  %vm924_vm4 = vcmp.lt.s32.totalorder %v907_v25, %v911_v29  ;;  %vm930_vm6 = vcmp.lt.s32.totalorder %v923_v28, %v914_v39  ;;  %v889_v15 = vunpack.c.h.bf16 %v1827_v38 }
 0x2ce   : > { %1280 = vst [vmem:[#allocation2 + $0x10] sm:$0xff] %v1223_v24   ;;  %v925_v54 = vsel %vm924_vm4, %v907_v25, %v911_v29  ;;  %v931_v11 = vsel %vm930_vm6, %v923_v28, %v914_v39 }
 0x2cf   : > { %v760_v42 = vpop.f32.mrf.mxu2  ;;  %v770_v43 = vpop.f32.mrf.mxu3 }
 0x2d0   : > { %vm787_vm12 = vcmp.gt.f32.partialorder %v760_v42, 0.0  ;;  %vm791_vm13 = vcmp.gt.f32.partialorder %v770_v43, 0.0  ;;  %v743_v37 = vpop.f32.mrf.mxu0  ;;  %v753_v17 = vpop.f32.mrf.mxu1 }
 0x2d1   : > { %v1177_v30 = vsel %vm787_vm12, 1.0, %v1385_v57  ;;  %v1181_v23 = vsel %vm791_vm13, 1.0, %v1385_v57  ;;  %vm780_vm14 = vcmp.gt.f32.partialorder %v743_v37, 0.0  ;;  %vm784_vm15 = vcmp.gt.f32.partialorder %v753_v17, 0.0 }
 0x2d2   : > { %v1229_v12 = vpack.c.bf16 %v1177_v30, %v1176_v19  ;;  %v1235_v33 = vpack.c.bf16 %v1181_v23, %v1180_v10  ;;  %vm899_vm0 = vcmp.eq.f32.partialorder %v1177_v30, %v883_v55  ;;  %v1170_v51 = vsel %vm780_vm14, 1.0, %v1385_v57 }
 0x2d3   : > { %v1174_v49 = vsel %vm784_vm15, 1.0, %v1385_v57  ;;  %vm892_vm2 = vcmp.eq.f32.partialorder %v1170_v51, %v876_v20  ;;  %v915_v41 = vsel %vm899_vm0, 1, %v1386_v34  ;;  %vm903_vm14 = vcmp.eq.f32.partialorder %v1181_v23, %v887_v32 }
 0x2d4   : > { %1282 = vst [vmem:[#allocation2 + $0x20] sm:$0xff] %v1229_v12   ;;  %vm896_vm3 = vcmp.eq.f32.partialorder %v1174_v49, %v880_v44  ;;  %v908_v40 = vsel %vm892_vm2, 1, %v1386_v34  ;;  %vm932_vm9 = vcmp.lt.s32.totalorder %v925_v54, %v915_v41  ;;  %vm938_vm2 = vcmp.lt.s32.totalorder %v931_v11, %v918_v63 }
 0x2d5   : > { %1284 = vst [vmem:[#allocation2 + $0x30] sm:$0xff] %v1235_v33   ;;  %v912_v21 = vsel %vm896_vm3, 1, %v1386_v34  ;;  %v933_v9 = vsel %vm932_vm9, %v925_v54, %v915_v41  ;;  %v919_v50 = vsel %vm903_vm14, 1, %v1386_v34  ;;  %v939_v26 = vsel %vm938_vm2, %v931_v11, %v918_v63 }
 0x2d6   : > { %vm926_vm5 = vcmp.lt.s32.totalorder %v908_v40, %v912_v21  ;;  %vm940_vm3 = vcmp.lt.s32.totalorder %v933_v9, %v919_v50 }
 0x2d7   : > { %v763_v4 = vpop.f32.mrf.mxu2  ;;  %v773_v52 = vpop.f32.mrf.mxu3  ;;  %v927_v35 = vsel %vm926_vm5, %v908_v40, %v912_v21  ;;  %v941_v24 = vsel %vm940_vm3, %v933_v9, %v919_v50 }
 0x2d8   : > { %vm788_vm7 = vcmp.gt.f32.partialorder %v763_v4, 0.0  ;;  %vm792_vm8 = vcmp.gt.f32.partialorder %v773_v52, 0.0  ;;  %v745_v6 = vpop.f32.mrf.mxu0  ;;  %v755_v58 = vpop.f32.mrf.mxu1 }
 0x2d9   : > { %v1178_v5 = vsel %vm788_vm7, 1.0, %v1385_v57  ;;  %vm781_vm10 = vcmp.gt.f32.partialorder %v745_v6, 0.0  ;;  %vm785_vm11 = vcmp.gt.f32.partialorder %v755_v58, 0.0  ;;  %v1182_v47 = vsel %vm792_vm8, 1.0, %v1385_v57 }
 0x2da   : > { %vm900_vm12 = vcmp.eq.f32.partialorder %v1178_v5, %v884_v45  ;;  %v1171_v8 = vsel %vm781_vm10, 1.0, %v1385_v57  ;;  %v1175_v46 = vsel %vm785_vm11, 1.0, %v1385_v57  ;;  %vm904_vm1 = vcmp.eq.f32.partialorder %v1182_v47, %v888_v1 }
 0x2db   : > { %v916_v7 = vsel %vm900_vm12, 1, %v1386_v34  ;;  %v1220_v60 = vpack.c.bf16 %v1171_v8, %v1170_v51  ;;  %vm893_vm13 = vcmp.eq.f32.partialorder %v1171_v8, %v877_v56  ;;  %v1226_v61 = vpack.c.bf16 %v1175_v46, %v1174_v49 }
 0x2dc   : > { %vm897_vm15 = vcmp.eq.f32.partialorder %v1175_v46, %v881_v3  ;;  %v909_v13 = vsel %vm893_vm13, 1, %v1386_v34  ;;  %vm934_vm0 = vcmp.lt.s32.totalorder %v927_v35, %v916_v7  ;;  %v920_v18 = vsel %vm904_vm1, 1, %v1386_v34 }
 0x2dd   : > { %1279 = vst [vmem:[#allocation2 + $0x8] sm:$0xff] %v1220_v60   ;;  %v913_v16 = vsel %vm897_vm15, 1, %v1386_v34  ;;  %v935_v31 = vsel %vm934_vm0, %v927_v35, %v916_v7  ;;  %vm946_vm11 = vcmp.lt.s32.totalorder %v939_v26, %v941_v24 }
 0x2de   : > { %1281 = vst [vmem:[#allocation2 + $0x18] sm:$0xff] %v1226_v61   ;;  %vm928_vm4 = vcmp.lt.s32.totalorder %v909_v13, %v913_v16  ;;  %vm942_vm9 = vcmp.lt.s32.totalorder %v935_v31, %v920_v18  ;;  %v947_v43 = vsel %vm946_vm11, %v939_v26, %v941_v24 }
 0x2df   : > { %v765_v48 = vpop.f32.mrf.mxu2  ;;  %v775_v14 = vpop.f32.mrf.mxu3  ;;  %v929_v19 = vsel %vm928_vm4, %v909_v13, %v913_v16 }
 0x2e0   : > { %vm789_vm5 = vcmp.gt.f32.partialorder %v765_v48, 0.0  ;;  %vm793_vm6 = vcmp.gt.f32.partialorder %v775_v14, 0.0 }
 0x2e1   : > { %v1179_v62 = vsel %vm789_vm5, 1.0, %v1385_v57  ;;  %v1183_v36 = vsel %vm793_vm6, 1.0, %v1385_v57  ;;  %v943_v57 = vsel %vm942_vm9, %v935_v31, %v920_v18 }
 0x2e2   : > { %v1232_v0 = vpack.c.bf16 %v1179_v62, %v1178_v5  ;;  %vm901_vm7 = vcmp.eq.f32.partialorder %v1179_v62, %v885_v59  ;;  %v1238_v22 = vpack.c.bf16 %v1183_v36, %v1182_v47  ;;  %vm905_vm8 = vcmp.eq.f32.partialorder %v1183_v36, %v889_v15 }
 0x2e3   : > { %v917_v27 = vsel %vm901_vm7, 1, %v1386_v34  ;;  %v921_v55 = vsel %vm905_vm8, 1, %v1386_v34 }
 0x2e4   : > { %1283 = vst [vmem:[#allocation2 + $0x28] sm:$0xff] %v1232_v0   ;;  %vm936_vm10 = vcmp.lt.s32.totalorder %v929_v19, %v917_v27 }
 0x2e5   : > { %1285 = vst [vmem:[#allocation2 + $0x38] sm:$0xff] %v1238_v22   ;;  %v937_v20 = vsel %vm936_vm10, %v929_v19, %v917_v27 }
 0x2e6   : > { %vm944_vm12 = vcmp.lt.s32.totalorder %v937_v20, %v921_v55 }
 0x2e7   : > { %v945_v42 = vsel %vm944_vm12, %v937_v20, %v921_v55 }
 0x2e8   : > { %vm948_vm13 = vcmp.lt.s32.totalorder %v943_v57, %v945_v42 }
 0x2e9   : > { %v949_v44 = vsel %vm948_vm13, %v943_v57, %v945_v42 }
 0x2ea   : > { %vm950_vm14 = vcmp.lt.s32.totalorder %v947_v43, %v949_v44 }
 0x2eb   : > { %v951_v2 = vsel %vm950_vm14, %v947_v43, %v949_v44 }
 0x2ec   : > { %v953_v10 = vshra.s32 %v951_v2, 16  ;;  %v952_v17 = vand.u32 65535, %v951_v2 }
 0x2ee   : > { %v955_v37 = vcvt.s32.f32 %v953_v10  ;;  %v954_v23 = vcvt.s32.f32 %v952_v17 }
 0x2f0   : > { %956 = vmin.xlane.f32.xlu0 %v955_v37 }
 0x363   : > { %v957_v30 = vpop.xlane.xlu0 %956 }
 0x364   : > { %vm958_vm15 = vcmp.eq.f32.partialorder %v955_v37, %v957_v30  ;;  %v963_v34 = vcvt.f32.s32 %v957_v30 }
 0x365   : > { %v959_v25 = vsel %vm958_vm15, %v954_v23, inf }
 0x366   : > { %960 = vmin.xlane.f32.xlu0 %v959_v25  ;;  %v964_v12 = vshll.u32 %v963_v34, 16 }
 0x3d9   : > { %v961_v29 = vpop.xlane.xlu0 %960 }
 0x3da   : > { %v962_v33 = vcvt.f32.s32 %v961_v29 }
 0x3dc   : > { %v965_v51 = vadd.s32 %v964_v12, %v962_v33 }
 0x3de   : > { %v966_v49 = vrot.slane %v965_v51, 4 }
 0x3e0   : > { %vm967_vm0 = vcmp.lt.s32.totalorder %v965_v51, %v966_v49 }
 0x3e1   : > { %v968_v53 = vsel %vm967_vm0, %v965_v51, %v966_v49 }
 0x3e2   : > { %v969_v38 = vrot.slane %v968_v53, 2 }
 0x3e4   : > { %vm970_vm1 = vcmp.lt.s32.totalorder %v968_v53, %v969_v38 }
 0x3e5   : > { %v971_v28 = vsel %vm970_vm1, %v968_v53, %v969_v38 }
 0x3e6   : > { %v972_v39 = vrot.slane %v971_v28, 1 }
 0x3e8   : > { %vm973_vm2 = vcmp.lt.s32.totalorder %v971_v28, %v972_v39 }
 0x3e9   : > { %v974_v40 = vsel %vm973_vm2, %v971_v28, %v972_v39 }
 0x3ea   : > { %1317 = vpush %v974_v40 }
 0x41b   : > { %s1318_s13 = spop %1317 }
 0x41c   : > { %976 = sst [smem:[#allocation3]] %s1318_s13 }
 0x41d PF: > { %s659_s11 = sadd.s32 1, %s1376_s11  }
 0x41e   : > { %p656_p1 = scmp.ge.s32.totalorder %s659_s11, 7  }
 0x41f   :  { %v1241_v21 = vld [vmem:[#allocation2] sm:$0xff] (%p656_p1)   ;;  %v1286_v41 = vld [vmem:[#allocation2 + $0x8] sm:$0xff] (%p656_p1)   ;;  %v1287_v32 = vld [vmem:[#allocation2 + $0x10] sm:$0xff] (%p656_p1)   ;;  %v993_v45 = vlaneseq (%p656_p1)  ;;  %s1387_s14 = smov (%p656_p1), [#allocation4]   ;;  %s1105_s18 = sshll.u32 (%p656_p1), %s1964_s1, 4  ;;  %s1106_s18 = int_to_ptr.hbm [resolvable:$true] %s1105_s18 }
 0x420   :  { %658 = sbr.rel (!%p656_p1) target bundleno = 534 (0x216), region = 36  ;;  %v1242_v1 = vunpack.c.l.bf16 (%p656_p1), %v1241_v21  ;;  %v1243_v63 = vunpack.c.h.bf16 (%p656_p1), %v1241_v21  ;;  %v1246_v4 = vunpack.c.l.bf16 (%p656_p1), %v1286_v41  ;;  %v1247_v52 = vunpack.c.h.bf16 (%p656_p1), %v1286_v41  ;;  %v1288_v56 = vld [vmem:[#allocation2 + $0x18] sm:$0xff] (%p656_p1)   ;;  %v1289_v3 = vld [vmem:[#allocation2 + $0x20] sm:$0xff] (%p656_p1)   ;;  %v1290_v54 = vld [vmem:[#allocation2 + $0x28] sm:$0xff] (%p656_p1)   ;;  %s1103_s15 = sshll.u32 (%p656_p1), %s1387_s14, 4  ;;  %s1104_s15 = int_to_ptr.vmem [resolvable:$true] %s1103_s15 }
 0x421   :  { %v1250_v6 = vunpack.c.l.bf16 (%p656_p1), %v1287_v32  ;;  %v1251_v58 = vunpack.c.h.bf16 (%p656_p1), %v1287_v32  ;;  %v1254_v5 = vunpack.c.l.bf16 (%p656_p1), %v1288_v56  ;;  %v1255_v35 = vunpack.c.h.bf16 (%p656_p1), %v1288_v56  ;;  %v1291_v8 = vld [vmem:[#allocation2 + $0x30] sm:$0xff] (%p656_p1)   ;;  %v1292_v46 = vld [vmem:[#allocation2 + $0x38] sm:$0xff] (%p656_p1)  }
 0x422   :  { %v1258_v7 = vunpack.c.l.bf16 (%p656_p1), %v1289_v3  ;;  %v1259_v47 = vunpack.c.h.bf16 (%p656_p1), %v1289_v3  ;;  %v1262_v60 = vunpack.c.l.bf16 (%p656_p1), %v1290_v54  ;;  %v1263_v11 = vunpack.c.h.bf16 (%p656_p1), %v1290_v54 }
 0x423   :  { %v1266_v61 = vunpack.c.l.bf16 (%p656_p1), %v1291_v8  ;;  %v1267_v9 = vunpack.c.h.bf16 (%p656_p1), %v1291_v8  ;;  %v1270_v13 = vunpack.c.l.bf16 (%p656_p1), %v1292_v46  ;;  %v1271_v16 = vunpack.c.h.bf16 (%p656_p1), %v1292_v46 }
 0x424   :  { %v994_v59 = vshrl.u32 (%p656_p1), %v993_v45, 7  ;;  %vm1864_vm3 = vcmp.gt.f32.partialorder (%p656_p1), %v1242_v1, 0.0  ;;  %vm1868_vm4 = vcmp.gt.f32.partialorder (%p656_p1), %v1243_v63, 0.0  ;;  %vm1872_vm5 = vcmp.gt.f32.partialorder (%p656_p1), %v1246_v4, 0.0 }
 0x425   :  { %vm1876_vm6 = vcmp.gt.f32.partialorder %v1247_v52, 0.0  ;;  %vm1880_vm7 = vcmp.gt.f32.partialorder %v1250_v6, 0.0  ;;  %vm1884_vm8 = vcmp.gt.f32.partialorder %v1251_v58, 0.0  ;;  %vm1888_vm9 = vcmp.gt.f32.partialorder %v1254_v5, 0.0 }
 0x426   :  { %v995_v36 = vadd.s32 8, %v994_v59  ;;  %v996_v0 = vadd.s32 16, %v994_v59  ;;  %v997_v22 = vadd.s32 24, %v994_v59  ;;  %v998_v24 = vadd.s32 32, %v994_v59 }
 0x427   :  { %v999_v27 = vadd.s32 40, %v994_v59  ;;  %v1000_v19 = vadd.s32 48, %v994_v59  ;;  %v1001_v26 = vadd.s32 56, %v994_v59  ;;  %v1002_v55 = vadd.s32 64, %v994_v59 }
 0x428   :  { %v1003_v20 = vadd.s32 72, %v994_v59  ;;  %v1004_v57 = vadd.s32 80, %v994_v59  ;;  %v1005_v42 = vadd.s32 88, %v994_v59  ;;  %v1006_v43 = vadd.s32 96, %v994_v59 }
 0x429   :  { %v1007_v44 = vadd.s32 104, %v994_v59  ;;  %v1008_v2 = vadd.s32 112, %v994_v59  ;;  %v1009_v10 = vadd.s32 120, %v994_v59  ;;  %vm1892_vm10 = vcmp.gt.f32.partialorder %v1255_v35, 0.0 }
 0x42a   :  { %vm1896_vm11 = vcmp.gt.f32.partialorder %v1258_v7, 0.0  ;;  %vm1900_vm12 = vcmp.gt.f32.partialorder %v1259_v47, 0.0  ;;  %vm1904_vm13 = vcmp.gt.f32.partialorder %v1262_v60, 0.0  ;;  %vm1908_vm14 = vcmp.gt.f32.partialorder %v1263_v11, 0.0 }
 0x42b   :  { %vm1912_vm15 = vcmp.gt.f32.partialorder %v1266_v61, 0.0  ;;  %vm1916_vm0 = vcmp.gt.f32.partialorder %v1267_v9, 0.0  ;;  %vm1920_vm1 = vcmp.gt.f32.partialorder %v1270_v13, 0.0  ;;  %vm1924_vm2 = vcmp.gt.f32.partialorder %v1271_v16, 0.0 }
 0x42c   :  { %v1042_v51 = vsel %vm1864_vm3, %v994_v59, 1073741824  ;;  %v1043_v49 = vsel %vm1868_vm4, %v995_v36, 1073741824  ;;  %v1044_v53 = vsel %vm1872_vm5, %v996_v0, 1073741824  ;;  %v1045_v38 = vsel %vm1876_vm6, %v997_v22, 1073741824 }
 0x42d   :  { %v1046_v28 = vsel %vm1880_vm7, %v998_v24, 1073741824  ;;  %v1047_v39 = vsel %vm1884_vm8, %v999_v27, 1073741824  ;;  %v1048_v40 = vsel %vm1888_vm9, %v1000_v19, 1073741824  ;;  %v1049_v21 = vsel %vm1892_vm10, %v1001_v26, 1073741824 }
 0x42e   :  { %v1050_v41 = vsel %vm1896_vm11, %v1002_v55, 1073741824  ;;  %v1051_v32 = vsel %vm1900_vm12, %v1003_v20, 1073741824  ;;  %v1052_v45 = vsel %vm1904_vm13, %v1004_v57, 1073741824  ;;  %v1053_v1 = vsel %vm1908_vm14, %v1005_v42, 1073741824 }
 0x42f   :  { %v1054_v63 = vsel %vm1912_vm15, %v1006_v43, 1073741824  ;;  %v1055_v4 = vsel %vm1916_vm0, %v1007_v44, 1073741824  ;;  %v1056_v52 = vsel %vm1920_vm1, %v1008_v2, 1073741824  ;;  %v1057_v56 = vsel %vm1924_vm2, %v1009_v10, 1073741824 }
 0x430   :  { %vm1058_vm3 = vcmp.lt.s32.totalorder %v1042_v51, %v1046_v28  ;;  %vm1060_vm4 = vcmp.lt.s32.totalorder %v1043_v49, %v1047_v39  ;;  %vm1062_vm5 = vcmp.lt.s32.totalorder %v1044_v53, %v1048_v40  ;;  %vm1064_vm6 = vcmp.lt.s32.totalorder %v1045_v38, %v1049_v21 }
 0x431   :  { %v1059_v3 = vsel %vm1058_vm3, %v1042_v51, %v1046_v28  ;;  %v1061_v54 = vsel %vm1060_vm4, %v1043_v49, %v1047_v39  ;;  %v1063_v6 = vsel %vm1062_vm5, %v1044_v53, %v1048_v40  ;;  %v1065_v58 = vsel %vm1064_vm6, %v1045_v38, %v1049_v21 }
 0x432   :  { %vm1066_vm7 = vcmp.lt.s32.totalorder %v1059_v3, %v1050_v41  ;;  %vm1068_vm8 = vcmp.lt.s32.totalorder %v1061_v54, %v1051_v32  ;;  %vm1070_vm9 = vcmp.lt.s32.totalorder %v1063_v6, %v1052_v45  ;;  %vm1072_vm10 = vcmp.lt.s32.totalorder %v1065_v58, %v1053_v1 }
 0x433   :  { %v1067_v5 = vsel %vm1066_vm7, %v1059_v3, %v1050_v41  ;;  %v1069_v35 = vsel %vm1068_vm8, %v1061_v54, %v1051_v32  ;;  %v1071_v8 = vsel %vm1070_vm9, %v1063_v6, %v1052_v45  ;;  %v1073_v46 = vsel %vm1072_vm10, %v1065_v58, %v1053_v1 }
 0x434   :  { %vm1074_vm11 = vcmp.lt.s32.totalorder %v1067_v5, %v1054_v63  ;;  %vm1076_vm12 = vcmp.lt.s32.totalorder %v1069_v35, %v1055_v4  ;;  %vm1078_vm13 = vcmp.lt.s32.totalorder %v1071_v8, %v1056_v52  ;;  %vm1080_vm14 = vcmp.lt.s32.totalorder %v1073_v46, %v1057_v56 }
 0x435   :  { %v1075_v7 = vsel %vm1074_vm11, %v1067_v5, %v1054_v63  ;;  %v1077_v47 = vsel %vm1076_vm12, %v1069_v35, %v1055_v4  ;;  %v1079_v60 = vsel %vm1078_vm13, %v1071_v8, %v1056_v52  ;;  %v1081_v11 = vsel %vm1080_vm14, %v1073_v46, %v1057_v56 }
 0x436   :  { %vm1082_vm15 = vcmp.lt.s32.totalorder %v1075_v7, %v1077_v47  ;;  %vm1084_vm0 = vcmp.lt.s32.totalorder %v1079_v60, %v1081_v11 }
 0x437   :  { %v1083_v61 = vsel %vm1082_vm15, %v1075_v7, %v1077_v47  ;;  %v1085_v9 = vsel %vm1084_vm0, %v1079_v60, %v1081_v11 }
 0x438   :  { %vm1086_vm1 = vcmp.lt.s32.totalorder %v1083_v61, %v1085_v9 }
 0x439   :  { %v1087_v13 = vsel %vm1086_vm1, %v1083_v61, %v1085_v9 }
 0x43a   :  { %v1088_v16 = vrot.slane %v1087_v13, 4 }
 0x43c   :  { %vm1089_vm2 = vcmp.lt.s32.totalorder %v1087_v13, %v1088_v16 }
 0x43d   :  { %v1090_v59 = vsel %vm1089_vm2, %v1087_v13, %v1088_v16 }
 0x43e   :  { %v1091_v15 = vrot.slane %v1090_v59, 2 }
 0x440   :  { %vm1092_vm3 = vcmp.lt.s32.totalorder %v1090_v59, %v1091_v15 }
 0x441   :  { %v1093_v50 = vsel %vm1092_vm3, %v1090_v59, %v1091_v15 }
 0x442   :  { %v1094_v48 = vrot.slane %v1093_v50, 1 }
 0x444   :  { %vm1095_vm4 = vcmp.lt.s32.totalorder %v1093_v50, %v1094_v48 }
 0x445   :  { %v1096_v14 = vsel %vm1095_vm4, %v1093_v50, %v1094_v48 }
 0x446   :  { %1097 = vst [vmem:[#allocation4] sm:$0x1] %v1096_v14 }
 0x447   :  { %1108 = dma.vmem_to_hbm [thread:$0]  %s1104_s15, 16, %s1106_s18, [#allocation5]  }
 0x448   :  { %1372 = dma.done.wait [#allocation5], 16  }
 0x449   :  { %1373 = vsyncadd [#allocation5], 4294967280 }
 0x44a   :  { %1113 = vsyncpa [#allocation5], 1 }

</bundles_post_ra>
